<compile_context>
chip_gen: v7x
topology: tpu7x:2x2x1
jax: 0.10.0
libtpu: 0.0.40
codegen_flags: <defaults>
</compile_context>

<pallas_src>
import math

import jax
import jax.numpy as jnp
from jax.experimental import pallas as pl
from jax.experimental.pallas import tpu as pltpu

# Shapes implied by the PyTorch module.
_L = 16          # sequence length (conv spatial dim)
_C = 5           # conv in_channels
_K = 3           # conv kernel size
_OC = 16         # conv out_channels
_LP = _L // 2    # pooled length
_KC = 16         # per-timestep im2col features, padded from K*C = 15 to 16
_H1 = 128        # fc1 width
_H2 = 64         # fc2 width (padded to 128 lanes inside the kernel)


def _tcr_kernel(x_ref, wc_ref, bc_ref, w1_ref, b1_ref, w2_ref, b2_ref, out_ref):
    # x_ref : (Bt, 256)  im2col input, feature index = t*16 + (k*5 + c)
    # wc_ref: (256, 256) block-banded conv weight, col index = pair*128 + tp*16 + oc
    # bc_ref: (1, 256)   conv bias broadcast over the 16 (pair, tp) groups
    # w1_ref: (128, 128) fc1 weight, row index = tp*16 + oc (flatten order baked in)
    # b1_ref: (1, 128)   fc1 bias
    # w2_ref: (128, 128) fc2 weight padded to 128 output lanes
    # b2_ref: (1, 128)   fc2 bias (zero-padded)
    # out_ref: (Bt, 128) lane-dense output block; wrapper keeps [:, :64]

    # Conv1d(k=3, pad=1): one MXU push, f32 accumulation, bias+ReLU on the VPU.
    conv = jnp.dot(x_ref[...], wc_ref[...], preferred_element_type=jnp.float32)
    conv = jnp.maximum(conv + bc_ref[...], 0.0)                  # (Bt, 256)

    # MaxPool1d(2,2): the two pool halves live in separate 128-lane (vreg-
    # aligned) slabs, so pooling is a single elementwise max -- and the result
    # is already the flattened fc1 input (lane index = tp*16 + oc).
    pooled = jnp.maximum(conv[:, :128], conv[:, 128:])           # (Bt, 128)

    # fc1 + ReLU: single (Bt,128)@(128,128) matmul.
    h1 = jnp.dot(pooled.astype(w1_ref.dtype), w1_ref[...],
                 preferred_element_type=jnp.float32)
    h1 = jnp.maximum(h1 + b1_ref[...], 0.0)                      # (Bt, 128)

    # fc2 (padded to 128 lanes so the output store is unmasked / lane-dense).
    out = jnp.dot(h1.astype(w2_ref.dtype), w2_ref[...],
                  preferred_element_type=jnp.float32) + b2_ref[...]
    out_ref[...] = out.astype(out_ref.dtype)


def tcr_conv1d_forward(x, conv_w, conv_b, fc1_w, fc1_b, fc2_w, fc2_b,
                       *, block_b=128, matmul_dtype=jnp.bfloat16):
    """x: (B, 16, 5). Weights in PyTorch layout:
    conv_w (16,5,3), conv_b (16,), fc1_w (128,128), fc1_b (128,),
    fc2_w (64,128), fc2_b (64,). Returns (B, 64) float32."""
    B, L, C = x.shape
    assert (L, C) == (_L, _C)
    OC, H1, H2, LP, KC = _OC, _H1, _H2, _LP, _KC

    # --- batch block: big blocks amortize the ~0.35us/step pipeline overhead,
    #     but keep >= 2 grid steps when the batch allows (2 TCs on v7x).
    b8 = ((B + 7) // 8) * 8
    cap = max(8, (b8 // 2) // 8 * 8) if b8 >= 16 else 8
    block_b = max(8, (min(block_b, cap) // 8) * 8)
    Bp = ((B + block_b - 1) // block_b) * block_b
    if Bp != B:
        x = jnp.pad(x, ((0, Bp - B), (0, 0), (0, 0)))

    # --- wrapper-side im2col (pure layout plumbing, tiny XLA ops) ------------
    xpad = jnp.pad(x, ((0, 0), (1, 1), (0, 0)))                  # (Bp, L+2, C)
    cols = jnp.stack([xpad[:, k:k + L, :] for k in range(_K)], axis=2)  # (Bp,L,K,C)
    cols = cols.reshape(Bp, L, _K * C)
    cols = jnp.pad(cols, ((0, 0), (0, 0), (0, KC - _K * C)))     # (Bp, L, 16)
    xim = cols.reshape(Bp, L * KC).astype(matmul_dtype)          # (Bp, 256)

    # --- conv as a block-banded (256, 256) weight ----------------------------
    # wk_flat[k*C + c, oc] = conv_w[oc, c, k]; padded to 16 rows.
    wk_flat = jnp.transpose(conv_w, (2, 1, 0)).reshape(_K * C, OC)
    wk_flat = jnp.pad(wk_flat, ((0, KC - _K * C), (0, 0)))       # (16, 16)
    # Wbig[t*16 + j, pair*128 + tp*16 + oc] = wk_flat[j, oc] with t = 2*tp+pair.
    wbig = jnp.zeros((L, KC, 2, LP, OC), jnp.float32)
    for t in range(L):
        wbig = wbig.at[t, :, t % 2, t // 2, :].set(wk_flat)
    wbig = wbig.reshape(L * KC, 2 * LP * OC).astype(matmul_dtype)   # (256, 256)
    bcb = jnp.tile(conv_b.astype(jnp.float32), 2 * LP).reshape(1, 2 * LP * OC)

    # --- fc1 weight: row index tp*16 + oc must hit PyTorch flat index oc*8+tp.
    w1 = jnp.transpose(fc1_w.reshape(H1, OC, LP), (2, 1, 0)).reshape(LP * OC, H1)
    w1 = w1.astype(matmul_dtype)
    b1 = fc1_b.reshape(1, H1).astype(jnp.float32)

    # --- fc2 padded to 128 lane-dense output columns (zeros in the pad). -----
    w2p = jnp.pad(fc2_w.T, ((0, 0), (0, H1 - H2))).astype(matmul_dtype)  # (128,128)
    b2p = jnp.pad(fc2_b, (0, H1 - H2)).reshape(1, H1).astype(jnp.float32)

    LF, NC = L * KC, 2 * LP * OC
    grid = (Bp // block_b,)
    # Weights use constant index_maps so Pallas keeps them VMEM-resident across
    # grid steps (footprint ~0.3 MiB total even with double buffering).
    out = pl.pallas_call(
        _tcr_kernel,
        out_shape=jax.ShapeDtypeStruct((Bp, H1), jnp.float32),
        grid=grid,
        in_specs=[
            pl.BlockSpec((block_b, LF), lambda b: (b, 0)),
            pl.BlockSpec((LF, NC), lambda b: (0, 0)),
            pl.BlockSpec((1, NC), lambda b: (0, 0)),
            pl.BlockSpec((LP * OC, H1), lambda b: (0, 0)),
            pl.BlockSpec((1, H1), lambda b: (0, 0)),
            pl.BlockSpec((H1, H1), lambda b: (0, 0)),
            pl.BlockSpec((1, H1), lambda b: (0, 0)),
        ],
        out_specs=pl.BlockSpec((block_b, H1), lambda b: (b, 0)),
        compiler_params=pltpu.CompilerParams(
            dimension_semantics=("parallel",)),
    )(xim, wbig, bcb, w1, b1, w2p, b2p)
    return out[:B, :H2]


def _reference(x, conv_w, conv_b, fc1_w, fc1_b, fc2_w, fc2_b):
    """Pure-JAX f32 mirror of the PyTorch forward."""
    B, L, C = x.shape
    OC = conv_w.shape[0]
    LP = L // 2
    xp = jnp.pad(x, ((0, 0), (1, 1), (0, 0)))
    y = sum(jnp.einsum("blc,oc->blo", xp[:, k:k + L, :], conv_w[:, :, k])
            for k in range(3)) + conv_b                      # (B, t, oc)
    y = jnp.maximum(y, 0.0)
    yc = jnp.transpose(y, (0, 2, 1))                         # (B, oc, t)
    pooled = jnp.max(yc.reshape(B, OC, LP, 2), axis=3)       # (B, oc, LP)
    flat = pooled.reshape(B, OC * LP)                        # channel-major flatten
    h1 = jnp.maximum(flat @ fc1_w.T + fc1_b, 0.0)
    return h1 @ fc2_w.T + fc2_b


if __name__ == "__main__":
    # Small shapes consistent with the module: seq_len=16, in_channels=5.
    B, L, C = 16, _L, _C
    OC, H1, H2 = _OC, _H1, _H2

    key = jax.random.PRNGKey(0)
    ks = jax.random.split(key, 7)
    x = jax.random.normal(ks[0], (B, L, C), jnp.float32)
    conv_w = jax.random.normal(ks[1], (OC, C, 3), jnp.float32) / math.sqrt(C * 3)
    conv_b = 0.1 * jax.random.normal(ks[2], (OC,), jnp.float32)
    fc1_w = jax.random.normal(ks[3], (H1, OC * (L // 2)), jnp.float32) / math.sqrt(OC * L // 2)
    fc1_b = 0.1 * jax.random.normal(ks[4], (H1,), jnp.float32)
    fc2_w = jax.random.normal(ks[5], (H2, H1), jnp.float32) / math.sqrt(H1)
    fc2_b = 0.1 * jax.random.normal(ks[6], (H2,), jnp.float32)

    out = tcr_conv1d_forward(x, conv_w, conv_b, fc1_w, fc1_b, fc2_w, fc2_b)
    jax.block_until_ready(out)

    ref = _reference(x, conv_w, conv_b, fc1_w, fc1_b, fc2_w, fc2_b)
    assert out.shape == (B, H2)
    # bf16 matmul operands (f32 accumulation) => looser tolerance vs f32 reference.
    err = float(jnp.max(jnp.abs(out - ref)))
    assert jnp.allclose(out, ref, atol=6e-2, rtol=6e-2), err

    print("KERNEL_OK")
</pallas_src>

<mosaic_0001>
module attributes {stable_mosaic.version = 11 : i64} {
  func.func @_tcr_kernel(%arg0: i32, %arg1: memref<8x256xbf16, #tpu.memory_space<vmem>>, %arg2: memref<256x256xbf16, #tpu.memory_space<vmem>>, %arg3: memref<1x256xf32, #tpu.memory_space<vmem>>, %arg4: memref<128x128xbf16, #tpu.memory_space<vmem>>, %arg5: memref<1x128xf32, #tpu.memory_space<vmem>>, %arg6: memref<128x128xbf16, #tpu.memory_space<vmem>>, %arg7: memref<1x128xf32, #tpu.memory_space<vmem>>, %arg8: memref<8x128xf32, #tpu.memory_space<vmem>>) attributes {dimension_semantics = [#tpu.dimension_semantics<parallel>], iteration_bounds = array<i64: 2>, scalar_prefetch = 0 : i64, scratch_operands = 0 : i64, tpu.core_type = #tpu.core_type<tc>, window_params = [{transform_indices = @transform_0, window_bounds = array<i64: 8, 256>}, {pipeline_mode = #tpu.pipeline_mode<synchronous>, transform_indices = @transform_1, window_bounds = array<i64: 256, 256>}, {pipeline_mode = #tpu.pipeline_mode<synchronous>, transform_indices = @transform_2, window_bounds = array<i64: 1, 256>}, {pipeline_mode = #tpu.pipeline_mode<synchronous>, transform_indices = @transform_3, window_bounds = array<i64: 128, 128>}, {pipeline_mode = #tpu.pipeline_mode<synchronous>, transform_indices = @transform_4, window_bounds = array<i64: 1, 128>}, {pipeline_mode = #tpu.pipeline_mode<synchronous>, transform_indices = @transform_5, window_bounds = array<i64: 128, 128>}, {pipeline_mode = #tpu.pipeline_mode<synchronous>, transform_indices = @transform_6, window_bounds = array<i64: 1, 128>}, {transform_indices = @transform_7, window_bounds = array<i64: 8, 128>}]} {
    %c0 = arith.constant 0 : index
    %c0_0 = arith.constant 0 : index
    %0 = vector.load %arg1[%c0, %c0_0] : memref<8x256xbf16, #tpu.memory_space<vmem>>, vector<8x256xbf16>
    %c0_1 = arith.constant 0 : index
    %c0_2 = arith.constant 0 : index
    %1 = vector.load %arg2[%c0_1, %c0_2] : memref<256x256xbf16, #tpu.memory_space<vmem>>, vector<256x256xbf16>
    %cst = arith.constant dense<0.000000e+00> : vector<8x256xf32>
    %2 = tpu.matmul %0, %1, %cst {dimension_numbers = #tpu.dot_dimension_numbers<[1], [0], [0], [1], [0, 0, 1, 1], [], []>} : vector<8x256xbf16>, vector<256x256xbf16>, vector<8x256xf32> -> vector<8x256xf32>
    %c0_3 = arith.constant 0 : index
    %c0_4 = arith.constant 0 : index
    %3 = vector.load %arg3[%c0_3, %c0_4] : memref<1x256xf32, #tpu.memory_space<vmem>>, vector<1x256xf32>
    %4 = vector.broadcast %3 : vector<1x256xf32> to vector<8x256xf32>
    %5 = arith.addf %2, %4 : vector<8x256xf32>
    %cst_5 = arith.constant 0.000000e+00 : f32
    %6 = vector.broadcast %cst_5 : f32 to vector<8x256xf32>
    %7 = arith.maximumf %5, %6 : vector<8x256xf32>
    %8 = vector.extract_strided_slice %7 {offsets = [0, 0], sizes = [8, 128], strides = [1, 1]} : vector<8x256xf32> to vector<8x128xf32>
    %9 = vector.extract_strided_slice %7 {offsets = [0, 128], sizes = [8, 128], strides = [1, 1]} : vector<8x256xf32> to vector<8x128xf32>
    %10 = arith.maximumf %8, %9 : vector<8x128xf32>
    %11 = arith.truncf %10 : vector<8x128xf32> to vector<8x128xbf16>
    %c0_6 = arith.constant 0 : index
    %c0_7 = arith.constant 0 : index
    %12 = vector.load %arg4[%c0_6, %c0_7] : memref<128x128xbf16, #tpu.memory_space<vmem>>, vector<128x128xbf16>
    %cst_8 = arith.constant dense<0.000000e+00> : vector<8x128xf32>
    %13 = tpu.matmul %11, %12, %cst_8 {dimension_numbers = #tpu.dot_dimension_numbers<[1], [0], [0], [1], [0, 0, 1, 1], [], []>} : vector<8x128xbf16>, vector<128x128xbf16>, vector<8x128xf32> -> vector<8x128xf32>
    %c0_9 = arith.constant 0 : index
    %c0_10 = arith.constant 0 : index
    %14 = vector.load %arg5[%c0_9, %c0_10] : memref<1x128xf32, #tpu.memory_space<vmem>>, vector<1x128xf32>
    %15 = vector.broadcast %14 : vector<1x128xf32> to vector<8x128xf32>
    %16 = arith.addf %13, %15 : vector<8x128xf32>
    %cst_11 = arith.constant 0.000000e+00 : f32
    %17 = vector.broadcast %cst_11 : f32 to vector<8x128xf32>
    %18 = arith.maximumf %16, %17 : vector<8x128xf32>
    %19 = arith.truncf %18 : vector<8x128xf32> to vector<8x128xbf16>
    %c0_12 = arith.constant 0 : index
    %c0_13 = arith.constant 0 : index
    %20 = vector.load %arg6[%c0_12, %c0_13] : memref<128x128xbf16, #tpu.memory_space<vmem>>, vector<128x128xbf16>
    %cst_14 = arith.constant dense<0.000000e+00> : vector<8x128xf32>
    %21 = tpu.matmul %19, %20, %cst_14 {dimension_numbers = #tpu.dot_dimension_numbers<[1], [0], [0], [1], [0, 0, 1, 1], [], []>} : vector<8x128xbf16>, vector<128x128xbf16>, vector<8x128xf32> -> vector<8x128xf32>
    %c0_15 = arith.constant 0 : index
    %c0_16 = arith.constant 0 : index
    %22 = vector.load %arg7[%c0_15, %c0_16] : memref<1x128xf32, #tpu.memory_space<vmem>>, vector<1x128xf32>
    %23 = vector.broadcast %22 : vector<1x128xf32> to vector<8x128xf32>
    %24 = arith.addf %21, %23 : vector<8x128xf32>
    %c0_17 = arith.constant 0 : index
    %c0_18 = arith.constant 0 : index
    %25 = vector.load %arg8[%c0_17, %c0_18] : memref<8x128xf32, #tpu.memory_space<vmem>>, vector<8x128xf32>
    tpu.vector_store %arg8[%c0_17, %c0_18], %24 {strides = array<i32>} : memref<8x128xf32, #tpu.memory_space<vmem>>, vector<8x128xf32>,
    return
  }
  func.func @transform_0(%arg0: i32) -> (i32, i32) {
    %c0_i32 = arith.constant 0 : i32
    %c0_i32_0 = arith.constant 0 : i32
    return %arg0, %c0_i32 : i32, i32
  }
  func.func @transform_1(%arg0: i32) -> (i32, i32) {
    %c0_i32 = arith.constant 0 : i32
    %c0_i32_0 = arith.constant 0 : i32
    %c0_i32_1 = arith.constant 0 : i32
    return %c0_i32, %c0_i32_0 : i32, i32
  }
  func.func @transform_2(%arg0: i32) -> (i32, i32) {
    %c0_i32 = arith.constant 0 : i32
    %c0_i32_0 = arith.constant 0 : i32
    %c0_i32_1 = arith.constant 0 : i32
    return %c0_i32, %c0_i32_0 : i32, i32
  }
  func.func @transform_3(%arg0: i32) -> (i32, i32) {
    %c0_i32 = arith.constant 0 : i32
    %c0_i32_0 = arith.constant 0 : i32
    %c0_i32_1 = arith.constant 0 : i32
    return %c0_i32, %c0_i32_0 : i32, i32
  }
  func.func @transform_4(%arg0: i32) -> (i32, i32) {
    %c0_i32 = arith.constant 0 : i32
    %c0_i32_0 = arith.constant 0 : i32
    %c0_i32_1 = arith.constant 0 : i32
    return %c0_i32, %c0_i32_0 : i32, i32
  }
  func.func @transform_5(%arg0: i32) -> (i32, i32) {
    %c0_i32 = arith.constant 0 : i32
    %c0_i32_0 = arith.constant 0 : i32
    %c0_i32_1 = arith.constant 0 : i32
    return %c0_i32, %c0_i32_0 : i32, i32
  }
  func.func @transform_6(%arg0: i32) -> (i32, i32) {
    %c0_i32 = arith.constant 0 : i32
    %c0_i32_0 = arith.constant 0 : i32
    %c0_i32_1 = arith.constant 0 : i32
    return %c0_i32, %c0_i32_0 : i32, i32
  }
  func.func @transform_7(%arg0: i32) -> (i32, i32) {
    %c0_i32 = arith.constant 0 : i32
    %c0_i32_0 = arith.constant 0 : i32
    return %arg0, %c0_i32 : i32, i32
  }
}

</mosaic_0001>

<bundles_post_ra>
// kernel: tpu_custom_call.1
= control target key start
LH: loop header
LB: loop body
LE: loop exit
PB: predicated region body
PF: predicated region fallthrough
CT: control target
= control target key end

     0   :  { %s1742_s0 = inlined_call_operand.hbm [shape: bf16[16,256], index: 0, kind: input, shape index: {}]   ;;  %s1743_s1 = inlined_call_operand.hbm [shape: bf16[256,256], index: 1, kind: input, shape index: {}]   ;;  %s1744_s2 = inlined_call_operand.vmem [shape: f32[1,256], index: 2, kind: input, shape index: {}]   ;;  %s1745_s3 = inlined_call_operand.hbm [shape: bf16[128,128], index: 3, kind: input, shape index: {}]   ;;  %s1746_s4 = inlined_call_operand.vmem [shape: f32[1,128], index: 4, kind: input, shape index: {}]   ;;  %s1747_s5 = inlined_call_operand.hbm [shape: bf16[128,128], index: 5, kind: input, shape index: {}]   ;;  %s1748_s6 = inlined_call_operand.vmem [shape: f32[1,128], index: 6, kind: input, shape index: {}]   ;;  %s1749_s7 = inlined_call_operand.hbm [shape: f32[16,128], index: 7, kind: output, shape index: {}]  }
   0x1   :  { %1754 = sst [smem:[#allocation16_spill]] %s1743_s1 }
   0x2   :  { %12 = vsyncpa [#allocation3], 0 }
   0x3   :  { %14 = vsyncpa [#allocation3 + $0x1], 0 }
   0x4   :  { %15 = vsyncpa [#allocation6], 0 }
   0x5   :  { %16 = vsyncpa [#allocation9], 0 }
   0x6   :  { %17 = vsyncpa [#allocation4], 0 }
   0x7   :  { %19 = vsyncpa [#allocation4 + $0x1], 0  ;;  %s1455_s24 = smov 0   ;;  %s1457_s25 = smov 0  }
   0x8   :  { %s1459_s26 = smov 0   ;;  %s1461_s27 = smov 0  }
   0x9 LB: > { %s1476_s28 = sadd.s32 4294967295, %s1402_s27   ;;  %s935_s29 = sadd.s32 4294967294, %s1402_s27   ;;  %s1402_s27 = sphi %s1461_s27, %s1777_s27   ;;  %s1398_s26 = sphi %s1459_s26, %s1776_s26   ;;  %s1394_s25 = sphi %s1457_s25, %s1775_s25   ;;  %s1390_s24 = sphi %s1455_s24, %s1774_s24  }
   0xa   : > { %p45_p0 = scmp.ne.s32.totalorder %s1394_s25, %s1390_s24  ;;  %p1750_p1 = scmp.eq.s32.totalorder %s1476_s28, 0 }
   0xb   : > { %p201_p3 = scmp.eq.s32.totalorder %s935_s29, 1  ;;  %p936_p5 = scmp.ge.s32.totalorder %s1402_s27, 1 }
   0xc   : > { %p1485_p4 = por %p1750_p1, %p45_p0  ;;  %p208_p7 = scmp.lt.s32.totalorder %s1402_s27, 3 }
   0xd   : > { %p1490_p6 = por %p201_p3, %p45_p0  ;;  %s1404_s10 = smov [#allocation5]  }
   0xe   : > { %s1755_s30 = scalar_select %p1485_p4, 1, 0 }
   0xf   : > { %s1756_s8 = scalar_select %p1490_p6, 1, 0 }
  0x10   : > { %p1495_p8 = pnand %p936_p5, %p208_p7  ;;  %s220_s11 = sshll.u32 %s1404_s10, 4  ;;  %s1499_s11 = int_to_ptr.vmem [resolvable:$true] %s220_s11 }
  0x11   : > { %1757 = sst [smem:[#allocation15_spill]] %s1756_s8  ;;  %s1405_s13 = smov [#allocation7]  }
  0x12   : > { %s1758_s9 = scalar_select %p1495_p8, 1, 0 }
  0x13   : > { %p1081_p9 = pneg %p1495_p8  ;;  %s236_s14 = sshll.u32 %s1405_s13, 4  ;;  %s1510_s14 = int_to_ptr.vmem [resolvable:$true] %s236_s14 }
  0x14   : > { %s1760_s1 = sld [smem:[#allocation16_spill]] }
  0x15   : > { %p1506_p11 = pnand %p1081_p9, %p1750_p1 }
  0x17   : > { %p1520_p13 = pneg %p1506_p11 }
  0x1a   : > { %s1214_s17 = scalar_lea.hbm %s1760_s1, 4096 }
  0x1b   : > { %p1215_p12 = scmp.ne.s32.totalorder %s1760_s1, %s1214_s17  ;;  %p1221_p5 = scmp.lt.u32.totalorder %s1214_s17, %s1760_s1 }
  0x1d   : > { %p1217_p0 = pnand %p1520_p13, %p1215_p12 }
  0x1f   : > { %p1218_p3 = pneg %p1217_p0 }
  0x21   : > { %p1223_p7 = pnand %p1221_p5, %p1218_p3 }
  0x23   : > { %1226 = shalt.err (!%p1223_p7)
}
  0x24   : > { %s1227_s23 = scalar_lea.vmem %s1499_s11, 4096  ;;  %p1235_p2 = scmp.lt.s32.totalorder %s1499_s11, %s1499_s11 }
  0x25   : > { %p1228_p9 = scmp.ne.s32.totalorder %s1499_s11, %s1227_s23  ;;  %p1236_p6 = scmp.lt.s32.totalorder %s1227_s23, %s1227_s23 }
  0x27   : > { %p1230_p10 = pnand %p1228_p9, %p1520_p13  ;;  %p1237_p12 = por %p1236_p6, %p1235_p2 }
  0x29   : > { %p1231_p1 = pneg %p1230_p10 }
  0x2b   : > { %p1238_p0 = pnand %p1237_p12, %p1231_p1 }
  0x2d   : > { %1241 = shalt.err (!%p1238_p0)
}
  0x2e   : > { %s1406_s29 = smov 128   ;;  %s1407_s10 = smov 8  }
  0x2f   : > { %1084 = dma.hbm_to_vmem [thread:$0]  (!%p1506_p11), %s1760_s1, 4096, %s1499_s11, [#allocation6], %s1406_s29, %s1406_s29, %s1407_s10  }
  0x30   : > { %s1242_s18 = scalar_lea.hbm %s1745_s3, 1024 }
  0x31   : > { %p1243_p2 = scmp.ne.s32.totalorder %s1745_s3, %s1242_s18  ;;  %p1249_p10 = scmp.lt.u32.totalorder %s1242_s18, %s1745_s3 }
  0x33   : > { %p1245_p1 = pnand %p1243_p2, %p1520_p13 }
  0x35   : > { %p1246_p6 = pneg %p1245_p1 }
  0x37   : > { %p1251_p3 = pnand %p1249_p10, %p1246_p6 }
  0x39   : > { %1254 = shalt.err (!%p1251_p3)
}
  0x3a   : > { %s1255_s11 = scalar_lea.vmem %s1510_s14, 1024  ;;  %p1263_p12 = scmp.lt.s32.totalorder %s1510_s14, %s1510_s14 }
  0x3b   : > { %p1256_p5 = scmp.ne.s32.totalorder %s1510_s14, %s1255_s11  ;;  %p1264_p0 = scmp.lt.s32.totalorder %s1255_s11, %s1255_s11 }
  0x3d   : > { %p1258_p7 = pnand %p1256_p5, %p1520_p13  ;;  %p1265_p2 = por %p1264_p0, %p1263_p12 }
  0x3f   : > { %p1259_p9 = pneg %p1258_p7 }
  0x41   : > { %p1266_p1 = pnand %p1265_p2, %p1259_p9 }
  0x43   : > { %1269 = shalt.err (!%p1266_p1)
}
  0x44   : > { %s1408_s29 = smov 64   ;;  %s1409_s10 = smov 4  }
  0x45   : > { %1087 = dma.hbm_to_vmem [thread:$0]  (!%p1506_p11), %s1745_s3, 1024, %s1510_s14, [#allocation6], %s1408_s29, %s1408_s29, %s1409_s10  }
  0x46   : > { %s1410_s16 = smov [#allocation8]   ;;  %s1565_s18 = sadd.s32 1, %s1402_s27  }
  0x47   : > { %s252_s17 = sshll.u32 %s1410_s16, 4  ;;  %s1270_s22 = scalar_lea.hbm %s1747_s5, 1024  ;;  %s253_s17 = int_to_ptr.vmem [resolvable:$true] %s252_s17 }
  0x48   : > { %p1271_p6 = scmp.ne.s32.totalorder %s1747_s5, %s1270_s22  ;;  %p1277_p5 = scmp.lt.u32.totalorder %s1270_s22, %s1747_s5 }
  0x4a   : > { %p1273_p10 = pnand %p1271_p6, %p1520_p13 }
  0x4c   : > { %p1274_p3 = pneg %p1273_p10 }
  0x4e   : > { %p1279_p7 = pnand %p1277_p5, %p1274_p3 }
  0x50   : > { %1282 = shalt.err (!%p1279_p7)
}
  0x51   : > { %s1283_s14 = scalar_lea.vmem %s253_s17, 1024  ;;  %p1291_p2 = scmp.lt.s32.totalorder %s253_s17, %s253_s17 }
  0x52   : > { %p1284_p9 = scmp.ne.s32.totalorder %s253_s17, %s1283_s14  ;;  %p1292_p1 = scmp.lt.s32.totalorder %s1283_s14, %s1283_s14 }
  0x54   : > { %p1286_p12 = pnand %p1284_p9, %p1520_p13  ;;  %p1293_p4 = por %p1292_p1, %p1291_p2 }
  0x56   : > { %p1287_p0 = pneg %p1286_p12 }
  0x58   : > { %p1294_p8 = pnand %p1293_p4, %p1287_p0 }
  0x5a   : > { %1297 = shalt.err (!%p1294_p8)
}
  0x5b   : > { %1090 = dma.hbm_to_vmem [thread:$0]  (!%p1506_p11), %s1747_s5, 1024, %s253_s17, [#allocation9], %s1408_s29, %s1408_s29, %s1409_s10  }
  0x5c   : > { %s29_s1 = ssub.s32 %s1402_s27, %s1565_s18  ;;  %s32_s8 = sadd.s32 1, %s1398_s26 }
  0x5d   : > { %p30_p4 = scmp.eq.s32.totalorder %s29_s1, 0  ;;  %p39_p8 = scmp.ne.s32.totalorder %s1398_s26, %s1394_s25 }
  0x5e   : > { %p40_p13 = scmp.eq.s32.totalorder %s1402_s27, 0  ;;  %p1102_p6 = scmp.lt.s32.totalorder %s1402_s27, 2 }
  0x5f   : > { %s1593_s12 = scalar_select %p30_p4, %s1398_s26, %s32_s8  }
  0x60   : > { %p41_p10 = por %p40_p13, %p39_p8  ;;  %p1762_p3 = scmp.eq.s32.totalorder %s1476_s28, 1 }
  0x61   : > { %s269_s16 = sand.u32 1, %s1398_s26   ;;  %s1006_s19 = sshll.u32 %s1402_s27, 7 }
  0x62   : > { %p1597_p5 = por %p1762_p3, %p39_p8  ;;  %s941_s21 = sshll.u32 %s269_s16, 3 }
  0x63   : > { %s1606_s29 = scalar_lea.hbm %s1742_s0, %s1006_s19  ;;  %s273_s10 = scalar_lea.vmem [#allocation2], %s941_s21 }
  0x64   : > { %s281_s17 = sshll.u32 %s273_s10, 4  ;;  %p1608_p11 = pnand %p1102_p6, %p41_p10  ;;  %s1612_s17 = int_to_ptr.vmem [resolvable:$true] %s281_s17 }
  0x65   : > { %s270_s14 = scalar_lea.sflag [#allocation3], %s269_s16  ;;  %s1298_s13 = scalar_lea.hbm %s1606_s29, 128 }
  0x66   : > { %p1299_p7 = scmp.ne.s32.totalorder %s1606_s29, %s1298_s13  ;;  %p1300_p9 = pneg %p1608_p11 }
  0x67   : > { %s1303_s8 = scalar_lea.hbm %s1742_s0, 256  ;;  %p1304_p2 = scmp.lt.u32.totalorder %s1606_s29, %s1742_s0 }
  0x68   : > { %p1301_p12 = pnand %p1300_p9, %p1299_p7  ;;  %p1305_p1 = scmp.lt.u32.totalorder %s1303_s8, %s1298_s13 }
  0x69   : > { %p1307_p8 = scmp.lt.u32.totalorder %s1298_s13, %s1606_s29 }
  0x6a   : > { %p1302_p0 = pneg %p1301_p12  ;;  %p1306_p4 = por %p1305_p1, %p1304_p2 }
  0x6c   : > { %p1308_p13 = por %p1307_p8, %p1306_p4 }
  0x6e   : > { %p1309_p6 = pnand %p1308_p13, %p1302_p0 }
  0x70   : > { %1312 = shalt.err (!%p1309_p6)
}
  0x71   : > { %s1313_s16 = scalar_lea.vmem %s1612_s17, 128  ;;  %s1411_s22 = smov [#allocation2]  }
  0x72   : > { %p1314_p10 = scmp.ne.s32.totalorder %s1612_s17, %s1313_s16  ;;  %s1318_s23 = sshll.u32 %s1411_s22, 4  ;;  %s1319_s23 = int_to_ptr.vmem [resolvable:$false] %s1318_s23 }
  0x73   : > { %s1320_s10 = scalar_lea.vmem %s1319_s23, 256  ;;  %p1321_p12 = scmp.lt.s32.totalorder %s1612_s17, %s1319_s23 }
  0x74   : > { %p1316_p3 = pnand %p1314_p10, %p1300_p9  ;;  %p1322_p2 = scmp.lt.s32.totalorder %s1320_s10, %s1313_s16 }
  0x76   : > { %p1317_p7 = pneg %p1316_p3  ;;  %p1323_p1 = por %p1322_p2, %p1321_p12 }
  0x78   : > { %p1324_p4 = pnand %p1323_p1, %p1317_p7 }
  0x7a   : > { %1327 = shalt.err (!%p1324_p4)
}
  0x7b   : > { %1094 = dma.hbm_to_vmem [thread:$0]  (!%p1608_p11), %s1606_s29, 128, %s1612_s17, %s270_s14  }
  0x7c   : > { %p1765_p0 = scmp.ne.s32.totalorder %s1758_s9, 0 }
  0x7d   : > { %s1642_s13 = sand.u32 (!%p1765_p0), 1, %s1394_s25   ;;  %p1766_p9 = scmp.ne.s32.totalorder (!%p1765_p0), %s1755_s30, 0 }
  0x7e   : > { %290 = sbr.rel (%p1765_p0) target bundleno = 873 (0x369), region = 48  ;;  %s945_s15 = sshll.u32 (!%p1765_p0), %s1642_s13, 3 }
  0x7f   : > { %s293_s1 = scalar_lea.sflag (!%p1765_p0), [#allocation3], %s1642_s13  ;;  %s1648_s8 = scalar_lea.vmem (!%p1765_p0), [#allocation2], %s945_s15 }
  0x85   : > { %1373 = dma.done.wait (%p1766_p9), %s293_s1, 128  }
  0x86   : > { %1375 = vsyncadd (%p1766_p9), %s293_s1, 4294967168  ;;  %p1767_p11 = scmp.eq.s32.totalorder %s1476_s28, 0 }
  0x88   : > { %1377 = dma.done.wait (%p1767_p11), [#allocation6], 5120   ;;  %p1768_p8 = pmov %p1767_p11 }
  0x8a   : > { %1379 = vsyncadd (%p1768_p8), [#allocation6], 4294962176  ;;  %p1769_p13 = pmov %p1768_p8 }
  0x8b   : > { %p1770_p6 = pmov %p1768_p8 }
  0x8c   : > { %1381 = dma.done.wait (%p1769_p13), [#allocation9], 1024  }
  0x8d   : > { %1383 = vsyncadd (%p1770_p6), [#allocation9], 4294966272  ;;  %v1412_v0 = vmov 0.0   ;;  %v1148_v1 = vld [vmem:[#allocation5 + $0x4] ss:$8 sps:$4 sm:$0xff]   ;;  %v340_v14 = vld [vmem:[%s1648_s8] sm:$0xff]  ;;  %v375_v44 = vlaneseq }
  0x8e   : > { %1025 = vmatprep.subr.bf16.mxu1 %v1412_v0  ;;  %v1150_v2 = vld [vmem:[#allocation5] ss:$8 sps:$4 sm:$0xff]   ;;  %552 = vmatprep.subr.bf16.mxu0 %v1148_v1  ;;  %v1151_v3 = vld [vmem:[#allocation5 + $0x14] ss:$8 sps:$4 sm:$0xff]   ;;  %v1153_v4 = vld [vmem:[#allocation5 + $0x10] ss:$8 sps:$4 sm:$0xff]   ;;  %v951_v15 = vcombine.high %v340_v14, %v340_v14  ;;  %v950_v41 = vcombine.low %v340_v14, %v340_v14 }
  0x8f   : > { %553 = vmatpush1.bf16.msra.mxu0 %v1150_v2  ;;  %v1154_v5 = vld [vmem:[#allocation5 + $0x24] ss:$8 sps:$4 sm:$0xff]   ;;  %v1156_v6 = vld [vmem:[#allocation5 + $0x20] ss:$8 sps:$4 sm:$0xff]   ;;  %v1157_v7 = vld [vmem:[#allocation5 + $0x34] ss:$8 sps:$4 sm:$0xff]  }
  0x90   : > { %554 = vmatprep.subr.bf16.mxu0 %v1151_v3  ;;  %v1159_v8 = vld [vmem:[#allocation5 + $0x30] ss:$8 sps:$4 sm:$0xff]   ;;  %v1160_v9 = vld [vmem:[#allocation5 + $0x44] ss:$8 sps:$4 sm:$0xff]   ;;  %v1162_v10 = vld [vmem:[#allocation5 + $0x40] ss:$8 sps:$4 sm:$0xff]   ;;  %584 = vmatprep.mubr.bf16.mxu0 %v951_v15 }
  0x91   : > { %v1163_v11 = vld [vmem:[#allocation5 + $0x54] ss:$8 sps:$4 sm:$0xff]   ;;  %v1165_v12 = vld [vmem:[#allocation5 + $0x50] ss:$8 sps:$4 sm:$0xff]   ;;  %v1166_v13 = vld [vmem:[#allocation5 + $0x64] ss:$8 sps:$4 sm:$0xff]  }
  0x92   : > { %v1198_v16 = vld [vmem:[#allocation7] sm:$0xff]   ;;  %v1169_v18 = vld [vmem:[#allocation5 + $0x74] ss:$8 sps:$4 sm:$0xff]   ;;  %v1199_v19 = vld [vmem:[#allocation7 + $0x8] sm:$0xff]   ;;  %vm1413_vm0 = vmmov 0   ;;  %v376_v45 = vshrl.u32 %v375_v44, 7 }
  0x93   : > { %555 = vmatpush1.bf16.msra.mxu0 %v1153_v4  ;;  %v1168_v17 = vld [vmem:[#allocation5 + $0x60] ss:$8 sps:$4 sm:$0xff]   ;;  %1026 = vmatpush3.bf16.msra.mxu1 %v1198_v16  ;;  %v1171_v20 = vld [vmem:[#allocation5 + $0x70] ss:$8 sps:$4 sm:$0xff]   ;;  %v1172_v21 = vld [vmem:[#allocation5 + $0x84] ss:$8 sps:$4 sm:$0xff]  }
  0x94   : > { %556 = vmatprep.subr.bf16.mxu0 %v1154_v5  ;;  %1027 = vmatprep.subr.bf16.mxu1 %v1412_v0  ;;  %v1200_v22 = vld [vmem:[#allocation7 + $0x10] sm:$0xff]   ;;  %v1174_v23 = vld [vmem:[#allocation5 + $0x80] ss:$8 sps:$4 sm:$0xff]   ;;  %v1201_v25 = vld [vmem:[#allocation7 + $0x18] sm:$0xff]   ;;  %v377_v46 = vsub.s32 0, %v376_v45  ;;  %v381_v48 = vsub.s32 1, %v376_v45 }
  0x95   : > { %v1175_v24 = vld [vmem:[#allocation5 + $0x94] ss:$8 sps:$4 sm:$0xff]   ;;  %v1177_v26 = vld [vmem:[#allocation5 + $0x90] ss:$8 sps:$4 sm:$0xff]   ;;  %v1178_v27 = vld [vmem:[#allocation5 + $0xa4] ss:$8 sps:$4 sm:$0xff]   ;;  %1041 = vmatprep.mubr.msk.bf16.mxu1 %vm1413_vm0, %v1412_v0 }
  0x96   : > { %v1202_v28 = vld [vmem:[#allocation7 + $0x20] sm:$0xff]   ;;  %v1181_v30 = vld [vmem:[#allocation5 + $0xb4] ss:$8 sps:$4 sm:$0xff]   ;;  %v1203_v31 = vld [vmem:[#allocation7 + $0x28] sm:$0xff]   ;;  %s1003_s19 = sshll.u32 %s1476_s28, 7  ;;  %s338_s21 = scalar_lea.vmem [#allocation10], %s945_s15 }
  0x97   : > { %557 = vmatpush1.bf16.msra.mxu0 %v1156_v6  ;;  %1028 = vmatpush3.bf16.msra.mxu1 %v1199_v19  ;;  %v1180_v29 = vld [vmem:[#allocation5 + $0xa0] ss:$8 sps:$4 sm:$0xff]   ;;  %v1183_v32 = vld [vmem:[#allocation5 + $0xb0] ss:$8 sps:$4 sm:$0xff]   ;;  %v1184_v33 = vld [vmem:[#allocation5 + $0xc4] ss:$8 sps:$4 sm:$0xff]   ;;  %s1698_s10 = scalar_lea.hbm %s1749_s7, %s1003_s19 }
  0x98   : > { %558 = vmatprep.subr.bf16.mxu0 %v1157_v7  ;;  %1029 = vmatprep.subr.bf16.mxu1 %v1412_v0  ;;  %v1186_v34 = vld [vmem:[#allocation5 + $0xc0] ss:$8 sps:$4 sm:$0xff]   ;;  %v1187_v35 = vld [vmem:[#allocation5 + $0xd4] ss:$8 sps:$4 sm:$0xff]   ;;  %v1189_v36 = vld [vmem:[#allocation5 + $0xd0] ss:$8 sps:$4 sm:$0xff]  }
  0x99   : > { %v1190_v37 = vld [vmem:[#allocation5 + $0xe4] ss:$8 sps:$4 sm:$0xff]   ;;  %v1192_v38 = vld [vmem:[#allocation5 + $0xe0] ss:$8 sps:$4 sm:$0xff]   ;;  %v1193_v39 = vld [vmem:[#allocation5 + $0xf4] ss:$8 sps:$4 sm:$0xff]  }
  0x9a   : > { %v1195_v40 = vld [vmem:[#allocation5 + $0xf0] ss:$8 sps:$4 sm:$0xff]   ;;  %v1206_v60 = vld [vmem:[#allocation8] sm:$0xff]   ;;  %v1207_v62 = vld [vmem:[#allocation8 + $0x8] sm:$0xff]   ;;  %s836_s16 = sshll.u32 %s338_s21, 4  ;;  %s823_s28 = scalar_lea.sflag [#allocation4], %s1642_s13  ;;  %s1700_s16 = int_to_ptr.vmem [resolvable:$true] %s836_s16 }
  0x9b   : > { %559 = vmatpush1.bf16.msra.mxu0 %v1159_v8  ;;  %1030 = vmatpush3.bf16.msra.mxu1 %v1200_v22  ;;  %v1204_v42 = vld [vmem:[#allocation7 + $0x30] sm:$0xff]   ;;  %v1205_v43 = vld [vmem:[#allocation7 + $0x38] sm:$0xff]   ;;  %v1210_v2 = vld [vmem:[#allocation8 + $0x20] sm:$0xff]   ;;  %s1328_s1 = scalar_lea.vmem %s1700_s16, 128  ;;  %s1414_s15 = smov [#allocation10]  }
  0x9c   : > { %560 = vmatprep.subr.bf16.mxu0 %v1160_v9  ;;  %1031 = vmatprep.subr.bf16.mxu1 %v1412_v0  ;;  %v373_v47 = vld [vmem:[%s1744_s2] sm:$0x3]  ;;  %v1209_v1 = vld [vmem:[#allocation8 + $0x18] sm:$0xff]   ;;  %v1211_v3 = vld [vmem:[#allocation8 + $0x28] sm:$0xff]   ;;  %p1329_p10 = scmp.ne.s32.totalorder %s1700_s16, %s1328_s1  ;;  %s1332_s8 = sshll.u32 %s1414_s15, 4  ;;  %s1333_s8 = int_to_ptr.vmem [resolvable:$false] %s1332_s8 }
  0x9d   : > { %v378_v49 = vrot.slane %v373_v47, %v377_v46  ;;  %v382_v50 = vrot.slane %v373_v47, %v381_v48  ;;  %v1208_v63 = vld [vmem:[#allocation8 + $0x10] sm:$0xff]   ;;  %v1213_v5 = vld [vmem:[#allocation8 + $0x38] sm:$0xff]   ;;  %s1334_s30 = scalar_lea.vmem %s1333_s8, 256  ;;  %p1335_p12 = scmp.lt.s32.totalorder %s1700_s16, %s1333_s8 }
  0x9e   : > { %v1212_v4 = vld [vmem:[#allocation8 + $0x30] sm:$0xff]   ;;  %p1330_p3 = pnand %p1329_p10, %p1597_p5  ;;  %p1336_p2 = scmp.lt.s32.totalorder %s1334_s30, %s1328_s1 }
  0x9f   : > { %561 = vmatpush1.bf16.msra.mxu0 %v1162_v10  ;;  %1032 = vmatpush3.bf16.msra.mxu1 %v1201_v25  ;;  %v984_v6 = vld [vmem:[%s1746_s4] ss:$0 sm:$0xff] }
  0xa0   : > { %562 = vmatprep.subr.bf16.mxu0 %v1163_v11  ;;  %1033 = vmatprep.subr.bf16.mxu1 %v1412_v0  ;;  %p1331_p7 = pneg %p1330_p3  ;;  %p1337_p1 = por %p1336_p2, %p1335_p12 }
  0xa2   : > { %p1338_p4 = pnand %p1337_p1, %p1331_p7 }
  0xa3   : > { %563 = vmatpush1.bf16.msra.mxu0 %v1165_v12  ;;  %1034 = vmatpush3.bf16.msra.mxu1 %v1202_v28 }
  0xa4   : > { %564 = vmatprep.subr.bf16.mxu0 %v1166_v13  ;;  %1035 = vmatprep.subr.bf16.mxu1 %v1412_v0 }
  0xa7   : > { %565 = vmatpush1.bf16.msra.mxu0 %v1168_v17  ;;  %1036 = vmatpush3.bf16.msra.mxu1 %v1203_v31 }
  0xa8   : > { %566 = vmatprep.subr.bf16.mxu0 %v1169_v18  ;;  %1037 = vmatprep.subr.bf16.mxu1 %v1412_v0 }
  0xab   : > { %567 = vmatpush1.bf16.msra.mxu0 %v1171_v20  ;;  %1038 = vmatpush3.bf16.msra.mxu1 %v1204_v42 }
  0xac   : > { %568 = vmatprep.subr.bf16.mxu0 %v1172_v21  ;;  %1039 = vmatprep.subr.bf16.mxu1 %v1412_v0 }
  0xaf   : > { %569 = vmatpush1.bf16.msra.mxu0 %v1174_v23  ;;  %1040 = vmatpush3.bf16.msra.mxu1 %v1205_v43 }
  0xb0   : > { %570 = vmatprep.subr.bf16.mxu0 %v1175_v24  ;;  %1045 = vmatprep.subr.bf16.mxu1 %v1412_v0 }
  0xb3   : > { %571 = vmatpush1.bf16.msra.mxu0 %v1177_v26 }
  0xb4   : > { %572 = vmatprep.subr.bf16.mxu0 %v1178_v27 }
  0xb7   : > { %573 = vmatpush1.bf16.msra.mxu0 %v1180_v29 }
  0xb8   : > { %574 = vmatprep.subr.bf16.mxu0 %v1181_v30 }
  0xbb   : > { %575 = vmatpush1.bf16.msra.mxu0 %v1183_v32 }
  0xbc   : > { %576 = vmatprep.subr.bf16.mxu0 %v1184_v33 }
  0xbf   : > { %577 = vmatpush1.bf16.msra.mxu0 %v1186_v34 }
  0xc0   : > { %578 = vmatprep.subr.bf16.mxu0 %v1187_v35 }
  0xc3   : > { %579 = vmatpush1.bf16.msra.mxu0 %v1189_v36 }
  0xc4   : > { %580 = vmatprep.subr.bf16.mxu0 %v1190_v37 }
  0xc7   : > { %581 = vmatpush1.bf16.msra.mxu0 %v1192_v38 }
  0xc8   : > { %582 = vmatprep.subr.bf16.mxu0 %v1193_v39 }
  0xcb   : > { %583 = vmatpush1.bf16.msra.mxu0 %v1195_v40 }
  0xce   : > { %585 = vmatmul.mubr.bf16.vlgmr.msra.gmra.mrb[0].mxu0 %v950_v41 }
 0x1a1   : > { %v586_v51 = vpop.f32.mrb[0].mxu0 }
 0x1a2   : > { %v587_v52 = vadd.f32 %v586_v51, %v378_v49  ;;  %v588_v53 = vpop.f32.mrb[1].mxu0 }
 0x1a3   : > { %v589_v54 = vadd.f32 %v588_v53, %v382_v50  ;;  %v590_v55 = vpop.f32.mrb[2].mxu0 }
 0x1a4   : > { %v593_v56 = vmax.f32 %v587_v52, 0.0  ;;  %v591_v57 = vpop.f32.mrb[3].mxu0 }
 0x1a5   : > { %v594_v58 = vmax.f32 %v589_v54, 0.0 }
 0x1a7   : > { %v595_v59 = vmax.f32 %v593_v56, %v594_v58 }
 0x1a9   : > { %v596_v61 = vpack.c.bf16 %v595_v59, %v595_v59 }
 0x1ab   : > { %1042 = vmatmul.mubr.bf16.vlgmr.msra.gmra.mrb[0].mxu1 %v596_v61 }
 0x1ac   : > { %1046 = vmatpush3.bf16.msra.mxu1 %v1206_v60  ;;  %1061 = vmatprep.mubr.msk.bf16.mxu1 %vm1413_vm0, %v1412_v0 }
 0x1ad   : > { %1047 = vmatprep.subr.bf16.mxu1 %v1412_v0 }
 0x1b0   : > { %1048 = vmatpush3.bf16.msra.mxu1 %v1207_v62 }
 0x1b1   : > { %1049 = vmatprep.subr.bf16.mxu1 %v1412_v0 }
 0x1b4   : > { %1050 = vmatpush3.bf16.msra.mxu1 %v1208_v63 }
 0x1b5   : > { %1051 = vmatprep.subr.bf16.mxu1 %v1412_v0 }
 0x1b8   : > { %1052 = vmatpush3.bf16.msra.mxu1 %v1209_v1 }
 0x1b9   : > { %1053 = vmatprep.subr.bf16.mxu1 %v1412_v0 }
 0x1bc   : > { %1054 = vmatpush3.bf16.msra.mxu1 %v1210_v2 }
 0x1bd   : > { %1055 = vmatprep.subr.bf16.mxu1 %v1412_v0 }
 0x1c0   : > { %1056 = vmatpush3.bf16.msra.mxu1 %v1211_v3 }
 0x1c1   : > { %1057 = vmatprep.subr.bf16.mxu1 %v1412_v0 }
 0x1c4   : > { %1058 = vmatpush3.bf16.msra.mxu1 %v1212_v4 }
 0x1c5   : > { %1059 = vmatprep.subr.bf16.mxu1 %v1412_v0  ;;  %v993_v0 = vld [vmem:[%s1748_s6] ss:$0 sm:$0xff] }
 0x1c8   : > { %1060 = vmatpush3.bf16.msra.mxu1 %v1213_v5 }
 0x27e   : > { %v702_v7 = vpop.f32.mrb[0].mxu1 }
 0x27f   : > { %v703_v8 = vadd.f32 %v984_v6, %v702_v7  ;;  %v1043_v9 = vpop.f32.mrb[1].mxu1 }
 0x280   : > { %v705_v10 = vpop.f32.mrb[2].mxu1 }
 0x281   : > { %v708_v11 = vmax.f32 %v703_v8, 0.0  ;;  %v1044_v12 = vpop.f32.mrb[3].mxu1 }
 0x283   : > { %v709_v13 = vpack.c.bf16 %v708_v11, %v708_v11 }
 0x285   : > { %1062 = vmatmul.mubr.bf16.vlgmr.msra.gmra.mrb[4].mxu1 %v709_v13 }
 0x358   : > { %v815_v14 = vpop.f32.mrb[4].mxu1 }
 0x359   : > { %v816_v15 = vadd.f32 %v993_v0, %v815_v14  ;;  %v1063_v16 = vpop.f32.mrb[5].mxu1 }
 0x35a   : > { %v818_v17 = vpop.f32.mrb[6].mxu1 }
 0x35b   : > { %821 = vst [vmem:[%s338_s21] sm:$0xff] %v816_v15  ;;  %v1064_v18 = vpop.f32.mrb[7].mxu1 }
 0x35c   : > { %1341 = shalt.err (!%p1338_p4)
}
 0x35d   : > { %s1342_s13 = scalar_lea.hbm %s1698_s10, 128  ;;  %s1346_s17 = scalar_lea.hbm %s1749_s7, 256 }
 0x35e   : > { %p1343_p0 = scmp.ne.s32.totalorder %s1698_s10, %s1342_s13  ;;  %p1347_p8 = scmp.lt.u32.totalorder %s1698_s10, %s1749_s7 }
 0x35f   : > { %p1348_p13 = scmp.lt.u32.totalorder %s1346_s17, %s1342_s13  ;;  %p1350_p10 = scmp.lt.u32.totalorder %s1342_s13, %s1698_s10 }
 0x360   : > { %p1344_p9 = pnand %p1343_p0, %p1597_p5 }
 0x361   : > { %p1349_p6 = por %p1348_p13, %p1347_p8 }
 0x362   : > { %p1345_p11 = pneg %p1344_p9 }
 0x363   : > { %p1351_p3 = por %p1350_p10, %p1349_p6 }
 0x365   : > { %p1352_p7 = pnand %p1351_p3, %p1345_p11 }
 0x367   : > { %1355 = shalt.err (!%p1352_p7)
}
 0x368   : > { %1079 = dma.vmem_to_hbm [thread:$0]  (%p1597_p5), %s1700_s16, 128, %s1698_s10, %s823_s28  }
 0x369 PF: > { %s1771_s19 = sld [smem:[#allocation15_spill]]  ;;  %s848_s21 = sand.u32 1, %s1390_s24  }
 0x36a   : > { %p1773_p2 = scmp.ge.s32.totalorder %s1402_s27, 2  ;;  %s849_s22 = scalar_lea.sflag [#allocation4], %s848_s21 }
 0x36f   : > { %p1772_p12 = scmp.ne.s32.totalorder %s1771_s19, 0 }
 0x371   : > { %p1096_p1 = pnand %p1773_p2, %p1772_p12 }
 0x373   : > { %1385 = dma.done.wait (!%p1096_p1), %s849_s22, 128  }
 0x374   : > { %1387 = vsyncadd (!%p1096_p1), %s849_s22, 4294967168  ;;  %p22_p4 = scmp.ge.s32.totalorder %s1565_s18, 4   ;;  %s1774_s24 = smov %s1394_s25 }
 0x375   : > { %s1775_s25 = smov %s1398_s26  ;;  %s1776_s26 = smov %s1593_s12 }
 0x376   : > { %s1777_s27 = smov %s1565_s18  ;;  %24 = sbr.rel (!%p22_p4) target bundleno = 9 (0x9), region = 105 }
 0x37d   :  { %854 = vsyncpa [#allocation3], 1 }
 0x37e   :  { %856 = vsyncpa [#allocation3 + $0x1], 1 }
 0x37f   :  { %857 = vsyncpa [#allocation6], 1 }
 0x380   :  { %858 = vsyncpa [#allocation9], 1 }
 0x381   :  { %859 = vsyncpa [#allocation4], 1 }
 0x382   :  { %861 = vsyncpa [#allocation4 + $0x1], 1 }

</bundles_post_ra>
